<compile_context>
chip_gen: v7x
topology: tpu7x:2x2x1
jax: 0.10.0
libtpu: 0.0.40
codegen_flags: <defaults>
</compile_context>

<pallas_src>
import functools
from typing import NamedTuple, Tuple

import numpy as np
import jax
import jax.numpy as jnp
from jax.experimental import pallas as pl
from jax.experimental.pallas import tpu as pltpu

LANE = 128        # TPU lane width
BF16_SUB = 16     # bf16 sublane packing (rows per vreg tile)


class MLPMeta(NamedTuple):
    conf: Tuple[int, ...]       # layer widths, e.g. (32, 64, 48, 16)
    w_offsets: Tuple[int, ...]  # slab row offset of each layer's W_t block
    in_rows: Tuple[int, ...]    # row extent (contraction dim) of each W_t block
    bias_row0: int              # slab row of bias 0 (bias i at bias_row0 + i)
    num_layers: int
    out_dim: int


def _round_up(n: int, m: int) -> int:
    return (n + m - 1) // m * m


def _mlp_kernel(x_ref, p_ref, o_ref, *, w_offsets, in_rows, bias_row0, num_layers):
    """x_ref: (B, conf[0]) f32;  p_ref: (rows, 128) bf16 packed slab;
    o_ref: (B, 128) f32 (lane-dense, padded output)."""
    y = x_ref[...].astype(jnp.bfloat16)               # bf16 into the MXU
    for i in range(num_layers):
        off, rows = w_offsets[i], in_rows[i]
        w = p_ref[off:off + rows, :]                  # (rows, 128) bf16, static view
        b = p_ref[bias_row0 + i:bias_row0 + i + 1, :].astype(jnp.float32)  # (1, 128)
        acc = jnp.dot(y, w, preferred_element_type=jnp.float32) + b        # f32 epilogue
        if i < num_layers - 1:
            y = jnp.maximum(acc, 0.0).astype(jnp.bfloat16)  # ReLU in f32, cast for MXU
        else:
            o_ref[...] = acc.astype(o_ref.dtype)      # unmasked (B,128) lane-dense store


def mlp_forward(x, slab, meta: MLPMeta):
    batch = x.shape[0]
    kernel = functools.partial(
        _mlp_kernel,
        w_offsets=meta.w_offsets,
        in_rows=meta.in_rows,
        bias_row0=meta.bias_row0,
        num_layers=meta.num_layers,
    )
    vmem = pl.BlockSpec(memory_space=pltpu.MemorySpace.VMEM)
    flops = 2 * batch * sum(i * o for i, o in zip(meta.conf[:-1], meta.conf[1:]))
    bytes_accessed = (x.size * x.dtype.itemsize
                      + slab.size * slab.dtype.itemsize
                      + batch * LANE * 4)
    out_padded = pl.pallas_call(
        kernel,
        out_shape=jax.ShapeDtypeStruct((batch, LANE), x.dtype),
        in_specs=[vmem, vmem],
        out_specs=vmem,
        cost_estimate=pl.CostEstimate(
            flops=flops, transcendentals=0, bytes_accessed=bytes_accessed),
    )(x, slab)
    return out_padded[:, :meta.out_dim]


def make_forward(meta: MLPMeta):
    @jax.jit
    def fwd(x, slab):
        return mlp_forward(x, slab, meta)
    return fwd


def init_params(conf, key):
    """PyTorch nn.Linear default init, f32, in PyTorch layout (out, in)."""
    layers = []
    for fan_in, fan_out in zip(conf[:-1], conf[1:]):
        key, kw, kb = jax.random.split(key, 3)
        bound = 1.0 / (fan_in ** 0.5)
        w = jax.random.uniform(kw, (fan_out, fan_in), jnp.float32, -bound, bound)
        b = jax.random.uniform(kb, (fan_out,), jnp.float32, -bound, bound)
        layers.append((w, b))
    return layers


def pack_params(layers, conf):
    """Pack all layers into one bf16 slab of shape (rows, 128).

    Layer i's transposed weight occupies rows [w_offsets[i], w_offsets[i]+in_rows[i])
    (zero-padded to 128 output columns and, for i>0, to 128 contraction rows);
    bias i lives in row bias_row0 + i (zero-padded to 128). All block starts are
    16-row aligned (bf16 sublane tile)."""
    num_layers = len(layers)
    # contraction extents as seen by the kernel: layer 0 consumes raw x width,
    # later layers consume the lane-128-padded previous activation.
    in_rows = [conf[0]] + [LANE] * (num_layers - 1)
    w_offsets, row = [], 0
    for r in in_rows:
        w_offsets.append(row)
        row += _round_up(r, BF16_SUB)
    bias_row0 = row
    total_rows = _round_up(bias_row0 + num_layers, BF16_SUB)

    slab = np.zeros((total_rows, LANE), dtype=np.float32)
    for i, (w, b) in enumerate(layers):
        fan_out, fan_in = w.shape
        slab[w_offsets[i]:w_offsets[i] + fan_in, :fan_out] = np.asarray(w).T
        slab[bias_row0 + i, :fan_out] = np.asarray(b)

    meta = MLPMeta(conf=tuple(conf), w_offsets=tuple(w_offsets),
                   in_rows=tuple(in_rows), bias_row0=bias_row0,
                   num_layers=num_layers, out_dim=conf[-1])
    return jnp.asarray(slab, dtype=jnp.bfloat16), meta


if __name__ == "__main__":
    conf = (32, 64, 48, 16)   # conf[0]=in_dim ... conf[-1]=out_dim
    batch = 8

    key = jax.random.PRNGKey(0)
    key, kx = jax.random.split(key)
    x = jax.random.normal(kx, (batch, conf[0]), jnp.float32)

    layers = init_params(conf, key)
    slab, meta = pack_params(layers, conf)

    net_forward = make_forward(meta)
    out = net_forward(x, slab)
    jax.block_until_ready(out)

    # Reference: same math with the same bf16 quantization of x / weights / biases
    # and f32 accumulation (matches the in-kernel numerics; semantics follow
    # PyTorch's x @ W^T + b with ReLU on all but the last layer).
    ref = x.astype(jnp.bfloat16)
    for i, (w, b) in enumerate(layers):
        wt = w.T.astype(jnp.bfloat16)
        bb = b.astype(jnp.bfloat16).astype(jnp.float32)
        ref = jnp.dot(ref, wt, preferred_element_type=jnp.float32) + bb
        if i < len(layers) - 1:
            ref = jnp.maximum(ref, 0.0).astype(jnp.bfloat16)
    ref = jnp.asarray(ref, jnp.float32)

    assert out.shape == (batch, conf[-1])
    assert jnp.allclose(out, ref, atol=2e-3, rtol=2e-3), \
        float(jnp.max(jnp.abs(out - ref)))

    print("KERNEL_OK")
</pallas_src>

<mosaic_0001>
module attributes {stable_mosaic.version = 11 : i64} {
  func.func @_mlp_kernel(%arg0: memref<8x32xf32, #tpu.memory_space<vmem>>, %arg1: memref<304x128xbf16, #tpu.memory_space<vmem>>, %arg2: memref<8x128xf32, #tpu.memory_space<vmem>>) attributes {dimension_semantics = [], scalar_prefetch = 0 : i64, scratch_operands = 0 : i64, tpu.core_type = #tpu.core_type<tc>} {
    %c0 = arith.constant 0 : index
    %c0_0 = arith.constant 0 : index
    %0 = vector.load %arg0[%c0, %c0_0] : memref<8x32xf32, #tpu.memory_space<vmem>>, vector<8x32xf32>
    %1 = arith.truncf %0 : vector<8x32xf32> to vector<8x32xbf16>
    %c0_1 = arith.constant 0 : index
    %c0_2 = arith.constant 0 : index
    %2 = vector.load %arg1[%c0_1, %c0_2] : memref<304x128xbf16, #tpu.memory_space<vmem>>, vector<32x128xbf16>
    %c288 = arith.constant 288 : index
    %c0_3 = arith.constant 0 : index
    %3 = vector.load %arg1[%c288, %c0_3] : memref<304x128xbf16, #tpu.memory_space<vmem>>, vector<1x128xbf16>
    %4 = arith.extf %3 : vector<1x128xbf16> to vector<1x128xf32>
    %cst = arith.constant dense<0.000000e+00> : vector<8x128xf32>
    %5 = tpu.matmul %1, %2, %cst {dimension_numbers = #tpu.dot_dimension_numbers<[1], [0], [0], [1], [0, 0, 1, 1], [], []>} : vector<8x32xbf16>, vector<32x128xbf16>, vector<8x128xf32> -> vector<8x128xf32>
    %6 = vector.broadcast %4 : vector<1x128xf32> to vector<8x128xf32>
    %7 = arith.addf %5, %6 : vector<8x128xf32>
    %cst_4 = arith.constant 0.000000e+00 : f32
    %8 = vector.broadcast %cst_4 : f32 to vector<8x128xf32>
    %9 = arith.maximumf %7, %8 : vector<8x128xf32>
    %10 = arith.truncf %9 : vector<8x128xf32> to vector<8x128xbf16>
    %c32 = arith.constant 32 : index
    %c0_5 = arith.constant 0 : index
    %11 = vector.load %arg1[%c32, %c0_5] : memref<304x128xbf16, #tpu.memory_space<vmem>>, vector<128x128xbf16>
    %c289 = arith.constant 289 : index
    %c0_6 = arith.constant 0 : index
    %12 = vector.load %arg1[%c289, %c0_6] : memref<304x128xbf16, #tpu.memory_space<vmem>>, vector<1x128xbf16>
    %13 = arith.extf %12 : vector<1x128xbf16> to vector<1x128xf32>
    %cst_7 = arith.constant dense<0.000000e+00> : vector<8x128xf32>
    %14 = tpu.matmul %10, %11, %cst_7 {dimension_numbers = #tpu.dot_dimension_numbers<[1], [0], [0], [1], [0, 0, 1, 1], [], []>} : vector<8x128xbf16>, vector<128x128xbf16>, vector<8x128xf32> -> vector<8x128xf32>
    %15 = vector.broadcast %13 : vector<1x128xf32> to vector<8x128xf32>
    %16 = arith.addf %14, %15 : vector<8x128xf32>
    %cst_8 = arith.constant 0.000000e+00 : f32
    %17 = vector.broadcast %cst_8 : f32 to vector<8x128xf32>
    %18 = arith.maximumf %16, %17 : vector<8x128xf32>
    %19 = arith.truncf %18 : vector<8x128xf32> to vector<8x128xbf16>
    %c160 = arith.constant 160 : index
    %c0_9 = arith.constant 0 : index
    %20 = vector.load %arg1[%c160, %c0_9] : memref<304x128xbf16, #tpu.memory_space<vmem>>, vector<128x128xbf16>
    %c290 = arith.constant 290 : index
    %c0_10 = arith.constant 0 : index
    %21 = vector.load %arg1[%c290, %c0_10] : memref<304x128xbf16, #tpu.memory_space<vmem>>, vector<1x128xbf16>
    %22 = arith.extf %21 : vector<1x128xbf16> to vector<1x128xf32>
    %cst_11 = arith.constant dense<0.000000e+00> : vector<8x128xf32>
    %23 = tpu.matmul %19, %20, %cst_11 {dimension_numbers = #tpu.dot_dimension_numbers<[1], [0], [0], [1], [0, 0, 1, 1], [], []>} : vector<8x128xbf16>, vector<128x128xbf16>, vector<8x128xf32> -> vector<8x128xf32>
    %24 = vector.broadcast %22 : vector<1x128xf32> to vector<8x128xf32>
    %25 = arith.addf %23, %24 : vector<8x128xf32>
    %c0_12 = arith.constant 0 : index
    %c0_13 = arith.constant 0 : index
    %26 = vector.load %arg2[%c0_12, %c0_13] : memref<8x128xf32, #tpu.memory_space<vmem>>, vector<8x128xf32>
    tpu.vector_store %arg2[%c0_12, %c0_13], %25 {strides = array<i32>} : memref<8x128xf32, #tpu.memory_space<vmem>>, vector<8x128xf32>,
    return
  }
}

</mosaic_0001>

<bundles_post_ra>
// kernel: fwd.1
= control target key start
LH: loop header
LB: loop body
LE: loop exit
PB: predicated region body
PF: predicated region fallthrough
CT: control target
= control target key end

     0   :  { %7 = vsyncpa [#allocation3], 0  ;;  %s620_s0 = inlined_call_operand.hbm [shape: f32[8,32], index: 0, kind: input, shape index: {}]   ;;  %s621_s1 = inlined_call_operand.hbm [shape: bf16[304,128], index: 1, kind: input, shape index: {}]   ;;  %s622_s2 = inlined_call_operand.hbm [shape: f32[8,128], index: 2, kind: output, shape index: {}]  }
   0x1   :  { %8 = vsyncpa [#allocation6], 0 }
   0x2   :  { %9 = vsyncpa [#allocation4], 0  ;;  %s531_s9 = smov [#allocation2]   ;;  %s532_s11 = smov [#allocation5]  }
   0x3   :  { %s16_s10 = sshll.u32 %s531_s9, 4  ;;  %s25_s12 = sshll.u32 %s532_s11, 4  ;;  %s17_s10 = int_to_ptr.vmem [resolvable:$true] %s16_s10  ;;  %s553_s12 = int_to_ptr.vmem [resolvable:$true] %s25_s12 }
   0x4   :  { %s459_s15 = scalar_lea.hbm %s620_s0, 128 }
   0x5   :  { %p460_p0 = scmp.ne.s32.totalorder %s620_s0, %s459_s15  ;;  %p463_p1 = scmp.lt.u32.totalorder %s459_s15, %s620_s0 }
   0x7   :  { %p465_p2 = pnand %p463_p1, %p460_p0 }
   0x9   :  { %468 = shalt.err (!%p465_p2)
}
   0xa   :  { %s469_s20 = scalar_lea.vmem %s17_s10, 128  ;;  %p474_p4 = scmp.lt.s32.totalorder %s17_s10, %s17_s10 }
   0xb   :  { %p470_p3 = scmp.ne.s32.totalorder %s17_s10, %s469_s20  ;;  %p475_p5 = scmp.lt.s32.totalorder %s469_s20, %s469_s20 }
   0xd   :  { %p476_p6 = por %p475_p5, %p474_p4 }
   0xf   :  { %p477_p7 = pnand %p476_p6, %p470_p3 }
  0x11   :  { %480 = shalt.err (!%p477_p7)
}
  0x12   :  { %19 = dma.hbm_to_vmem [thread:$0]  %s620_s0, 128, %s17_s10, [#allocation3]  }
  0x13   :  { %s481_s25 = scalar_lea.hbm %s621_s1, 2432 }
  0x14   :  { %p482_p8 = scmp.ne.s32.totalorder %s621_s1, %s481_s25  ;;  %p485_p9 = scmp.lt.u32.totalorder %s481_s25, %s621_s1 }
  0x16   :  { %p487_p10 = pnand %p485_p9, %p482_p8 }
  0x18   :  { %490 = shalt.err (!%p487_p10)
}
  0x19   :  { %s491_s30 = scalar_lea.vmem %s553_s12, 2432  ;;  %p496_p12 = scmp.lt.s32.totalorder %s553_s12, %s553_s12 }
  0x1a   :  { %p492_p11 = scmp.ne.s32.totalorder %s553_s12, %s491_s30  ;;  %p497_p13 = scmp.lt.s32.totalorder %s491_s30, %s491_s30 }
  0x1c   :  { %p498_p0 = por %p497_p13, %p496_p12 }
  0x1e   :  { %p499_p1 = pnand %p498_p0, %p492_p11 }
  0x20   :  { %502 = shalt.err (!%p499_p1)
}
  0x21   :  { %s533_s0 = smov 64   ;;  %s534_s3 = smov 4  }
  0x22   :  { %31 = dma.hbm_to_vmem [thread:$0]  %s621_s1, 2432, %s553_s12, [#allocation6], %s533_s0, %s533_s0, %s534_s3  }
  0x23   :  { %525 = dma.done.wait [#allocation3], 128  }
  0x24   :  { %526 = vsyncadd [#allocation3], 4294967168 }
  0x25   :  { %527 = dma.done.wait [#allocation6], 2432  }
  0x26   :  { %528 = vsyncadd [#allocation6], 4294964864  ;;  %v535_v0 = vmov 0.0   ;;  %vm536_vm0 = vmmov 0   ;;  %v441_v1 = vld [vmem:[#allocation5] sm:$0xff]   ;;  %v442_v2 = vld [vmem:[#allocation5 + $0x8] sm:$0xff]   ;;  %v47_v19 = vlaneseq }
  0x27   :  { %386 = vmatprep.subr.bf16.mxu0 %v535_v0  ;;  %390 = vmatprep.mubr.msk.bf16.mxu0 %vm536_vm0, %v535_v0  ;;  %v39_v3 = vld [vmem:[#allocation2] sm:$0xff]  ;;  %v443_v4 = vld [vmem:[#allocation5 + $0x10] sm:$0xff]   ;;  %vm63_vm1 = vcmask 261120   ;;  %v445_v7 = vld [vmem:[#allocation5 + $0x20] sm:$0xff]   ;;  %s537_s1 = smov [#allocation7]  }
  0x28   :  { %394 = vmatprep.subr.bf16.mxu1 %v535_v0  ;;  %410 = vmatprep.mubr.msk.bf16.mxu1 %vm536_vm0, %v535_v0  ;;  %v40_v5 = vpack.c.bf16 %v39_v3, %v39_v3  ;;  %v444_v6 = vld [vmem:[#allocation5 + $0x18] sm:$0xff]   ;;  %v446_v8 = vld [vmem:[#allocation5 + $0x28] sm:$0xff]   ;;  %v447_v9 = vld [vmem:[#allocation5 + $0x30] sm:$0xff]   ;;  %v48_v20 = vshrl.u32 %v47_v19, 7  ;;  %s336_s6 = sshll.u32 %s537_s1, 4  ;;  %s337_s6 = int_to_ptr.vmem [resolvable:$true] %s336_s6 }
  0x29   :  { %387 = vmatpush3.bf16.msra.mxu0 %v441_v1  ;;  %395 = vmatpush3.bf16.msra.mxu1 %v443_v4  ;;  %v448_v10 = vld [vmem:[#allocation5 + $0x38] sm:$0xff]   ;;  %v449_v11 = vld [vmem:[#allocation5 + $0x40] sm:$0xff]   ;;  %v450_v12 = vld [vmem:[#allocation5 + $0x48] sm:$0xff]   ;;  %s503_s7 = scalar_lea.vmem %s337_s6, 128  ;;  %p508_p3 = scmp.lt.s32.totalorder %s337_s6, %s337_s6 }
  0x2a   :  { %388 = vmatprep.subr.bf16.mxu0 %v535_v0  ;;  %396 = vmatprep.subr.bf16.mxu1 %v535_v0  ;;  %v451_v13 = vld [vmem:[#allocation5 + $0x50] sm:$0xff]   ;;  %v452_v14 = vld [vmem:[#allocation5 + $0x58] sm:$0xff]   ;;  %v453_v15 = vld [vmem:[#allocation5 + $0x60] sm:$0xff]   ;;  %v49_v23 = vsub.s32 0, %v48_v20  ;;  %v127_v34 = vsub.s32 1, %v48_v20  ;;  %v239_v45 = vsub.s32 2, %v48_v20  ;;  %p504_p2 = scmp.ne.s32.totalorder %s337_s6, %s503_s7  ;;  %p509_p4 = scmp.lt.s32.totalorder %s503_s7, %s503_s7 }
  0x2b   :  { %v454_v16 = vld [vmem:[#allocation5 + $0x68] sm:$0xff]   ;;  %v455_v17 = vld [vmem:[#allocation5 + $0x70] sm:$0xff]   ;;  %v456_v18 = vld [vmem:[#allocation5 + $0x78] sm:$0xff]  }
  0x2c   :  { %v45_v21 = vld [vmem:[#allocation5 + $0x90] sm:$0x1]  ;;  %v457_v32 = vld [vmem:[#allocation5 + $0x80] sm:$0xff]   ;;  %v458_v33 = vld [vmem:[#allocation5 + $0x88] sm:$0xff]   ;;  %p510_p5 = por %p509_p4, %p508_p3 }
  0x2d   :  { %389 = vmatpush3.bf16.msra.mxu0 %v442_v2  ;;  %397 = vmatpush3.bf16.msra.mxu1 %v444_v6  ;;  %v46_v22 = vunpack.c.l.bf16 %v45_v21  ;;  %v235_v43 = vld [vmem:[#allocation5 + $0x90] sm:$0x2] }
  0x2e   :  { %414 = vmatprep.subr.bf16.mxu0 %v535_v0  ;;  %398 = vmatprep.subr.bf16.mxu1 %v535_v0  ;;  %v236_v44 = vunpack.c.l.bf16 %v235_v43  ;;  %p511_p6 = pnand %p510_p5, %p504_p2 }
  0x2f   :  { %v50_v24 = vrot.slane %v46_v22, %v49_v23  ;;  %v128_v35 = vrot.slane %v46_v22, %v127_v34 }
  0x30   :  { %391 = vmatmul.mubr.msk.bf16.vlgmr.msra.gmra.mrb[0].mxu0 %vm63_vm1, %v40_v5  ;;  %v240_v46 = vrot.slane %v236_v44, %v239_v45 }
  0x31   :  { %430 = vmatprep.mubr.msk.bf16.mxu0 %vm536_vm0, %v535_v0  ;;  %399 = vmatpush3.bf16.msra.mxu1 %v445_v7 }
  0x32   :  { %400 = vmatprep.subr.bf16.mxu1 %v535_v0  ;;  %415 = vmatpush3.bf16.msra.mxu0 %v451_v13 }
  0x33   :  { %416 = vmatprep.subr.bf16.mxu0 %v535_v0 }
  0x35   :  { %401 = vmatpush3.bf16.msra.mxu1 %v446_v8 }
  0x36   :  { %402 = vmatprep.subr.bf16.mxu1 %v535_v0  ;;  %417 = vmatpush3.bf16.msra.mxu0 %v452_v14 }
  0x37   :  { %418 = vmatprep.subr.bf16.mxu0 %v535_v0 }
  0x39   :  { %403 = vmatpush3.bf16.msra.mxu1 %v447_v9 }
  0x3a   :  { %404 = vmatprep.subr.bf16.mxu1 %v535_v0  ;;  %419 = vmatpush3.bf16.msra.mxu0 %v453_v15 }
  0x3b   :  { %420 = vmatprep.subr.bf16.mxu0 %v535_v0 }
  0x3d   :  { %405 = vmatpush3.bf16.msra.mxu1 %v448_v10 }
  0x3e   :  { %406 = vmatprep.subr.bf16.mxu1 %v535_v0  ;;  %421 = vmatpush3.bf16.msra.mxu0 %v454_v16 }
  0x3f   :  { %422 = vmatprep.subr.bf16.mxu0 %v535_v0 }
  0x41   :  { %407 = vmatpush3.bf16.msra.mxu1 %v449_v11 }
  0x42   :  { %408 = vmatprep.subr.bf16.mxu1 %v535_v0  ;;  %423 = vmatpush3.bf16.msra.mxu0 %v455_v17 }
  0x43   :  { %424 = vmatprep.subr.bf16.mxu0 %v535_v0 }
  0x45   :  { %409 = vmatpush3.bf16.msra.mxu1 %v450_v12 }
  0x46   :  { %425 = vmatpush3.bf16.msra.mxu0 %v456_v18 }
  0x47   :  { %426 = vmatprep.subr.bf16.mxu0 %v535_v0 }
  0x4a   :  { %427 = vmatpush3.bf16.msra.mxu0 %v457_v32 }
  0x4b   :  { %428 = vmatprep.subr.bf16.mxu0 %v535_v0 }
  0x4e   :  { %429 = vmatpush3.bf16.msra.mxu0 %v458_v33 }
 0x103   :  { %v101_v25 = vpop.f32.mrb[0].mxu0 }
 0x104   :  { %v102_v26 = vadd.f32 %v101_v25, %v50_v24  ;;  %v392_v27 = vpop.f32.mrb[1].mxu0 }
 0x105   :  { %v104_v28 = vpop.f32.mrb[2].mxu0 }
 0x106   :  { %v107_v29 = vmax.f32 %v102_v26, 0.0  ;;  %v393_v30 = vpop.f32.mrb[3].mxu0 }
 0x108   :  { %v108_v31 = vpack.c.bf16 %v107_v29, %v107_v29 }
 0x10a   :  { %411 = vmatmul.mubr.bf16.vlgmr.msra.gmra.mrb[0].mxu1 %v108_v31 }
 0x1dd   :  { %v211_v36 = vpop.f32.mrb[0].mxu1 }
 0x1de   :  { %v212_v37 = vadd.f32 %v211_v36, %v128_v35  ;;  %v412_v38 = vpop.f32.mrb[1].mxu1 }
 0x1df   :  { %v214_v39 = vpop.f32.mrb[2].mxu1 }
 0x1e0   :  { %v217_v40 = vmax.f32 %v212_v37, 0.0  ;;  %v413_v41 = vpop.f32.mrb[3].mxu1 }
 0x1e2   :  { %v218_v42 = vpack.c.bf16 %v217_v40, %v217_v40 }
 0x1e4   :  { %431 = vmatmul.mubr.bf16.vlgmr.msra.gmra.mrb[4].mxu0 %v218_v42 }
 0x2b7   :  { %v323_v47 = vpop.f32.mrb[4].mxu0 }
 0x2b8   :  { %v324_v48 = vadd.f32 %v323_v47, %v240_v46  ;;  %v432_v49 = vpop.f32.mrb[5].mxu0 }
 0x2b9   :  { %v326_v50 = vpop.f32.mrb[6].mxu0 }
 0x2ba   :  { %329 = vst [vmem:[#allocation7] sm:$0xff] %v324_v48  ;;  %v433_v51 = vpop.f32.mrb[7].mxu0 }
 0x2bb   :  { %514 = shalt.err (!%p511_p6)
}
 0x2bc   :  { %s515_s10 = scalar_lea.hbm %s622_s2, 128 }
 0x2bd   :  { %p516_p7 = scmp.ne.s32.totalorder %s622_s2, %s515_s10  ;;  %p519_p8 = scmp.lt.u32.totalorder %s515_s10, %s622_s2 }
 0x2bf   :  { %p521_p9 = pnand %p519_p8, %p516_p7 }
 0x2c1   :  { %524 = shalt.err (!%p521_p9)
}
 0x2c2   :  { %339 = dma.vmem_to_hbm [thread:$0]  %s337_s6, 128, %s622_s2, [#allocation4]  }
 0x2c3   :  { %529 = dma.done.wait [#allocation4], 128  }
 0x2c4   :  { %530 = vsyncadd [#allocation4], 4294967168 }
 0x2c5   :  { %343 = vsyncpa [#allocation3], 1 }
 0x2c6   :  { %344 = vsyncpa [#allocation6], 1 }
 0x2c7   :  { %345 = vsyncpa [#allocation4], 1 }

</bundles_post_ra>
